<compile_context>
chip_gen: v7x
topology: tpu7x:2x2x1
jax: 0.10.0
libtpu: 0.0.40
codegen_flags: <defaults>
</compile_context>

<pallas_src>
import functools

import jax
import jax.numpy as jnp
from jax.experimental import pallas as pl
from jax.experimental.pallas import tpu as pltpu


def _round_up(n, m):
    return ((n + m - 1) // m) * m


def _policy_kernel(num_layers, eps, compute_dtype, *refs):
    # refs layout:
    #   x_ref, obs_mean_ref, obs_var_ref,
    #   (w_i, b_i) * num_layers,
    #   wm_ref, bm_ref,
    #   loc_out_ref
    x_ref = refs[0]
    mu_ref = refs[1]
    var_ref = refs[2]
    layer_refs = refs[3:3 + 2 * num_layers]
    wm_ref = refs[3 + 2 * num_layers]
    bm_ref = refs[4 + 2 * num_layers]
    loc_ref = refs[5 + 2 * num_layers]

    # RunningMeanStd normalization + clamp (f32 on the VPU/EUP).
    x = x_ref[...]
    xn = (x - mu_ref[...]) * jax.lax.rsqrt(var_ref[...] + eps)
    xn = jnp.clip(xn, -5.0, 5.0)

    # MLP trunk: Linear + Tanh.  Matmul operands in compute_dtype (bf16 feeds
    # the MXU at full rate on v6e/v7x), accumulation + tanh in f32.
    h = xn.astype(compute_dtype)
    for i in range(num_layers):
        w = layer_refs[2 * i][...]          # (prev_pad, hid_pad), compute_dtype
        b = layer_refs[2 * i + 1][...]      # (1, hid_pad), f32
        z = jnp.dot(h, w, preferred_element_type=jnp.float32) + b
        h = jnp.tanh(z).astype(compute_dtype)

    # Mean head; output columns are padded to a lane-dense multiple of 128,
    # so this store is an unmasked full-lane vst.
    loc = jnp.dot(h, wm_ref[...], preferred_element_type=jnp.float32) + bm_ref[...]
    loc_ref[...] = loc.astype(loc_ref.dtype)


def normal_mlp_policy_forward(x, params, *, num_layers, batch_tile=256,
                              eps=1e-8, use_bf16=True):
    """Returns (loc, scale) of the Normal distribution produced by the policy."""
    B, input_size = x.shape
    hidden_size = params["layers"][0][0].shape[1]
    output_size = params["mean_w"].shape[1]

    compute_dtype = jnp.bfloat16 if use_bf16 else jnp.float32

    # Lane-dense padding of the feature dims (exact in the valid columns).
    in_pad = _round_up(input_size, 128)
    hid_pad = _round_up(hidden_size, 128)
    out_pad = _round_up(output_size, 128)

    # Large batch tile to fill the MXU M dimension and amortize per-step
    # overhead; never larger than the (sublane-rounded) batch itself.
    batch_tile = max(8, min(batch_tile, _round_up(B, 8)))
    B_pad = _round_up(B, batch_tile)
    num_tiles = B_pad // batch_tile

    x_p = jnp.pad(x.astype(jnp.float32),
                  ((0, B_pad - B), (0, in_pad - input_size)))
    mu_p = jnp.pad(params["obs_mean"], ((0, 0), (0, in_pad - input_size)))
    # Pad var with 1.0 so padded columns normalize to exactly 0.
    var_p = jnp.pad(params["obs_var"], ((0, 0), (0, in_pad - input_size)),
                    constant_values=1.0)

    operands = [x_p, mu_p, var_p]
    prev_pad = in_pad
    for (w, b) in params["layers"]:
        w_p = jnp.pad(w, ((0, prev_pad - w.shape[0]), (0, hid_pad - w.shape[1])))
        b_p = jnp.pad(b, ((0, 0), (0, hid_pad - b.shape[1])))
        operands.extend([w_p.astype(compute_dtype), b_p])
        prev_pad = hid_pad
    wm_p = jnp.pad(params["mean_w"],
                   ((0, hid_pad - hidden_size), (0, out_pad - output_size)))
    bm_p = jnp.pad(params["mean_b"], ((0, 0), (0, out_pad - output_size)))
    operands.extend([wm_p.astype(compute_dtype), bm_p])

    # x (and loc) are tiled over the batch grid; params use whole-array blocks
    # with constant index maps, so Pallas keeps them resident across steps.
    in_specs = [pl.BlockSpec((batch_tile, in_pad), lambda i: (i, 0))]
    in_specs += [pl.BlockSpec(op.shape, lambda i: (0, 0)) for op in operands[1:]]
    out_specs = pl.BlockSpec((batch_tile, out_pad), lambda i: (i, 0))

    kernel = functools.partial(_policy_kernel, num_layers, eps, compute_dtype)

    loc_padded = pl.pallas_call(
        kernel,
        out_shape=jax.ShapeDtypeStruct((B_pad, out_pad), jnp.float32),
        grid_spec=pltpu.PrefetchScalarGridSpec(
            num_scalar_prefetch=0,
            grid=(num_tiles,),
            in_specs=in_specs,
            out_specs=out_specs,
        ),
        compiler_params=pltpu.CompilerParams(
            dimension_semantics=("parallel",),
        ),
    )(*operands)

    loc = loc_padded[:B, :output_size]
    # scale = exp(logstd) is x-independent: computed once outside the kernel.
    scale = jnp.broadcast_to(jnp.exp(params["logstd"]), (B, output_size))
    return loc, scale


def init_params(key, input_size, output_size, hidden_size, num_layers):
    """Deterministic init mirroring nn.Linear default (uniform +/- 1/sqrt(fan_in))."""
    params = {}
    layers = []
    for i in range(num_layers):
        in_dim = input_size if i == 0 else hidden_size
        key, kw, kb = jax.random.split(key, 3)
        bound = 1.0 / jnp.sqrt(in_dim)
        w = jax.random.uniform(kw, (in_dim, hidden_size), jnp.float32, -bound, bound)
        b = jax.random.uniform(kb, (1, hidden_size), jnp.float32, -bound, bound)
        layers.append((w, b))
    params["layers"] = layers

    key, kw, kb = jax.random.split(key, 3)
    bound = 1.0 / jnp.sqrt(hidden_size)
    params["mean_w"] = jax.random.uniform(
        kw, (hidden_size, output_size), jnp.float32, -bound, bound)
    params["mean_b"] = jax.random.uniform(
        kb, (1, output_size), jnp.float32, -bound, bound)

    params["logstd"] = jnp.zeros((1, output_size), jnp.float32)

    # RunningMeanStd stats (fresh: mean=0, var=1)
    params["obs_mean"] = jnp.zeros((1, input_size), jnp.float32)
    params["obs_var"] = jnp.ones((1, input_size), jnp.float32)
    return params


def reference_forward(x, params, eps=1e-8, compute_dtype=jnp.float32):
    xn = (x - params["obs_mean"]) / jnp.sqrt(params["obs_var"] + eps)
    xn = jnp.clip(xn, -5.0, 5.0)
    h = xn.astype(compute_dtype)
    for w, b in params["layers"]:
        z = jnp.dot(h, w.astype(compute_dtype),
                    preferred_element_type=jnp.float32) + b
        h = jnp.tanh(z).astype(compute_dtype)
    loc = jnp.dot(h, params["mean_w"].astype(compute_dtype),
                  preferred_element_type=jnp.float32) + params["mean_b"]
    scale = jnp.broadcast_to(jnp.exp(params["logstd"]), loc.shape)
    return loc, scale


if __name__ == "__main__":
    input_size = 16
    output_size = 4
    hidden_size = 32
    num_layers = 2
    batch = 8

    key = jax.random.PRNGKey(0)
    key, kx = jax.random.split(key)
    x = jax.random.normal(kx, (batch, input_size), jnp.float32) * 3.0

    params = init_params(key, input_size, output_size, hidden_size, num_layers)

    # Exact f32 path: validates kernel structure / normalization / padding.
    loc32, scale32 = normal_mlp_policy_forward(
        x, params, num_layers=num_layers, use_bf16=False)
    jax.block_until_ready((loc32, scale32))
    ref_loc, ref_scale = reference_forward(x, params)
    assert jnp.allclose(loc32, ref_loc, atol=1e-5, rtol=1e-5)
    assert jnp.allclose(scale32, ref_scale, atol=1e-6, rtol=1e-6)

    # Default bf16-MXU path: compare against a reference using the same bf16
    # matmul operands (f32 accumulation), which is the precision policy chosen.
    loc, scale = normal_mlp_policy_forward(x, params, num_layers=num_layers)
    jax.block_until_ready((loc, scale))
    ref_loc_bf16, _ = reference_forward(x, params, compute_dtype=jnp.bfloat16)
    assert jnp.allclose(loc, ref_loc_bf16, atol=5e-3, rtol=5e-3)
    assert jnp.allclose(scale, ref_scale, atol=1e-6, rtol=1e-6)

    print("KERNEL_OK")
</pallas_src>

<mosaic_0001>
module attributes {stable_mosaic.version = 11 : i64} {
  func.func @_policy_kernel(%arg0: i32, %arg1: memref<8x128xf32, #tpu.memory_space<vmem>>, %arg2: memref<1x128xf32, #tpu.memory_space<vmem>>, %arg3: memref<1x128xf32, #tpu.memory_space<vmem>>, %arg4: memref<128x128xf32, #tpu.memory_space<vmem>>, %arg5: memref<1x128xf32, #tpu.memory_space<vmem>>, %arg6: memref<128x128xf32, #tpu.memory_space<vmem>>, %arg7: memref<1x128xf32, #tpu.memory_space<vmem>>, %arg8: memref<128x128xf32, #tpu.memory_space<vmem>>, %arg9: memref<1x128xf32, #tpu.memory_space<vmem>>, %arg10: memref<8x128xf32, #tpu.memory_space<vmem>>) attributes {dimension_semantics = [#tpu.dimension_semantics<parallel>], iteration_bounds = array<i64: 1>, scalar_prefetch = 0 : i64, scratch_operands = 0 : i64, tpu.core_type = #tpu.core_type<tc>, window_params = [{transform_indices = @transform_0, window_bounds = array<i64: 8, 128>}, {pipeline_mode = #tpu.pipeline_mode<synchronous>, transform_indices = @transform_1, window_bounds = array<i64: 1, 128>}, {pipeline_mode = #tpu.pipeline_mode<synchronous>, transform_indices = @transform_2, window_bounds = array<i64: 1, 128>}, {pipeline_mode = #tpu.pipeline_mode<synchronous>, transform_indices = @transform_3, window_bounds = array<i64: 128, 128>}, {pipeline_mode = #tpu.pipeline_mode<synchronous>, transform_indices = @transform_4, window_bounds = array<i64: 1, 128>}, {pipeline_mode = #tpu.pipeline_mode<synchronous>, transform_indices = @transform_5, window_bounds = array<i64: 128, 128>}, {pipeline_mode = #tpu.pipeline_mode<synchronous>, transform_indices = @transform_6, window_bounds = array<i64: 1, 128>}, {pipeline_mode = #tpu.pipeline_mode<synchronous>, transform_indices = @transform_7, window_bounds = array<i64: 128, 128>}, {pipeline_mode = #tpu.pipeline_mode<synchronous>, transform_indices = @transform_8, window_bounds = array<i64: 1, 128>}, {transform_indices = @transform_9, window_bounds = array<i64: 8, 128>}]} {
    %c0 = arith.constant 0 : index
    %c0_0 = arith.constant 0 : index
    %0 = vector.load %arg1[%c0, %c0_0] : memref<8x128xf32, #tpu.memory_space<vmem>>, vector<8x128xf32>
    %c0_1 = arith.constant 0 : index
    %c0_2 = arith.constant 0 : index
    %1 = vector.load %arg2[%c0_1, %c0_2] : memref<1x128xf32, #tpu.memory_space<vmem>>, vector<1x128xf32>
    %2 = vector.broadcast %1 : vector<1x128xf32> to vector<8x128xf32>
    %3 = arith.subf %0, %2 : vector<8x128xf32>
    %c0_3 = arith.constant 0 : index
    %c0_4 = arith.constant 0 : index
    %4 = vector.load %arg3[%c0_3, %c0_4] : memref<1x128xf32, #tpu.memory_space<vmem>>, vector<1x128xf32>
    %cst = arith.constant 9.99999993E-9 : f32
    %5 = vector.broadcast %cst : f32 to vector<1x128xf32>
    %6 = arith.addf %4, %5 : vector<1x128xf32>
    %7 = math.rsqrt %6 : vector<1x128xf32>
    %8 = vector.broadcast %7 : vector<1x128xf32> to vector<8x128xf32>
    %9 = arith.mulf %3, %8 : vector<8x128xf32>
    %cst_5 = arith.constant -5.000000e+00 : f32
    %cst_6 = arith.constant 5.000000e+00 : f32
    %10 = vector.broadcast %cst_5 : f32 to vector<8x128xf32>
    %11 = arith.maximumf %10, %9 : vector<8x128xf32>
    %12 = vector.broadcast %cst_6 : f32 to vector<8x128xf32>
    %13 = arith.minimumf %12, %11 : vector<8x128xf32>
    %c0_7 = arith.constant 0 : index
    %c0_8 = arith.constant 0 : index
    %14 = vector.load %arg4[%c0_7, %c0_8] : memref<128x128xf32, #tpu.memory_space<vmem>>, vector<128x128xf32>
    %c0_9 = arith.constant 0 : index
    %c0_10 = arith.constant 0 : index
    %15 = vector.load %arg5[%c0_9, %c0_10] : memref<1x128xf32, #tpu.memory_space<vmem>>, vector<1x128xf32>
    %cst_11 = arith.constant dense<0.000000e+00> : vector<8x128xf32>
    %16 = tpu.matmul %13, %14, %cst_11 {dimension_numbers = #tpu.dot_dimension_numbers<[1], [0], [0], [1], [0, 0, 1, 1], [], []>} : vector<8x128xf32>, vector<128x128xf32>, vector<8x128xf32> -> vector<8x128xf32>
    %17 = vector.broadcast %15 : vector<1x128xf32> to vector<8x128xf32>
    %18 = arith.addf %16, %17 : vector<8x128xf32>
    %19 = math.tanh %18 : vector<8x128xf32>
    %c0_12 = arith.constant 0 : index
    %c0_13 = arith.constant 0 : index
    %20 = vector.load %arg6[%c0_12, %c0_13] : memref<128x128xf32, #tpu.memory_space<vmem>>, vector<128x128xf32>
    %c0_14 = arith.constant 0 : index
    %c0_15 = arith.constant 0 : index
    %21 = vector.load %arg7[%c0_14, %c0_15] : memref<1x128xf32, #tpu.memory_space<vmem>>, vector<1x128xf32>
    %cst_16 = arith.constant dense<0.000000e+00> : vector<8x128xf32>
    %22 = tpu.matmul %19, %20, %cst_16 {dimension_numbers = #tpu.dot_dimension_numbers<[1], [0], [0], [1], [0, 0, 1, 1], [], []>} : vector<8x128xf32>, vector<128x128xf32>, vector<8x128xf32> -> vector<8x128xf32>
    %23 = vector.broadcast %21 : vector<1x128xf32> to vector<8x128xf32>
    %24 = arith.addf %22, %23 : vector<8x128xf32>
    %25 = math.tanh %24 : vector<8x128xf32>
    %c0_17 = arith.constant 0 : index
    %c0_18 = arith.constant 0 : index
    %26 = vector.load %arg8[%c0_17, %c0_18] : memref<128x128xf32, #tpu.memory_space<vmem>>, vector<128x128xf32>
    %cst_19 = arith.constant dense<0.000000e+00> : vector<8x128xf32>
    %27 = tpu.matmul %25, %26, %cst_19 {dimension_numbers = #tpu.dot_dimension_numbers<[1], [0], [0], [1], [0, 0, 1, 1], [], []>} : vector<8x128xf32>, vector<128x128xf32>, vector<8x128xf32> -> vector<8x128xf32>
    %c0_20 = arith.constant 0 : index
    %c0_21 = arith.constant 0 : index
    %28 = vector.load %arg9[%c0_20, %c0_21] : memref<1x128xf32, #tpu.memory_space<vmem>>, vector<1x128xf32>
    %29 = vector.broadcast %28 : vector<1x128xf32> to vector<8x128xf32>
    %30 = arith.addf %27, %29 : vector<8x128xf32>
    %c0_22 = arith.constant 0 : index
    %c0_23 = arith.constant 0 : index
    %31 = vector.load %arg10[%c0_22, %c0_23] : memref<8x128xf32, #tpu.memory_space<vmem>>, vector<8x128xf32>
    tpu.vector_store %arg10[%c0_22, %c0_23], %30 {strides = array<i32>} : memref<8x128xf32, #tpu.memory_space<vmem>>, vector<8x128xf32>,
    return
  }
  func.func @transform_0(%arg0: i32) -> (i32, i32) {
    %c0_i32 = arith.constant 0 : i32
    %c0_i32_0 = arith.constant 0 : i32
    return %arg0, %c0_i32 : i32, i32
  }
  func.func @transform_1(%arg0: i32) -> (i32, i32) {
    %c0_i32 = arith.constant 0 : i32
    %c0_i32_0 = arith.constant 0 : i32
    %c0_i32_1 = arith.constant 0 : i32
    return %c0_i32, %c0_i32_0 : i32, i32
  }
  func.func @transform_2(%arg0: i32) -> (i32, i32) {
    %c0_i32 = arith.constant 0 : i32
    %c0_i32_0 = arith.constant 0 : i32
    %c0_i32_1 = arith.constant 0 : i32
    return %c0_i32, %c0_i32_0 : i32, i32
  }
  func.func @transform_3(%arg0: i32) -> (i32, i32) {
    %c0_i32 = arith.constant 0 : i32
    %c0_i32_0 = arith.constant 0 : i32
    %c0_i32_1 = arith.constant 0 : i32
    return %c0_i32, %c0_i32_0 : i32, i32
  }
  func.func @transform_4(%arg0: i32) -> (i32, i32) {
    %c0_i32 = arith.constant 0 : i32
    %c0_i32_0 = arith.constant 0 : i32
    %c0_i32_1 = arith.constant 0 : i32
    return %c0_i32, %c0_i32_0 : i32, i32
  }
  func.func @transform_5(%arg0: i32) -> (i32, i32) {
    %c0_i32 = arith.constant 0 : i32
    %c0_i32_0 = arith.constant 0 : i32
    %c0_i32_1 = arith.constant 0 : i32
    return %c0_i32, %c0_i32_0 : i32, i32
  }
  func.func @transform_6(%arg0: i32) -> (i32, i32) {
    %c0_i32 = arith.constant 0 : i32
    %c0_i32_0 = arith.constant 0 : i32
    %c0_i32_1 = arith.constant 0 : i32
    return %c0_i32, %c0_i32_0 : i32, i32
  }
  func.func @transform_7(%arg0: i32) -> (i32, i32) {
    %c0_i32 = arith.constant 0 : i32
    %c0_i32_0 = arith.constant 0 : i32
    %c0_i32_1 = arith.constant 0 : i32
    return %c0_i32, %c0_i32_0 : i32, i32
  }
  func.func @transform_8(%arg0: i32) -> (i32, i32) {
    %c0_i32 = arith.constant 0 : i32
    %c0_i32_0 = arith.constant 0 : i32
    %c0_i32_1 = arith.constant 0 : i32
    return %c0_i32, %c0_i32_0 : i32, i32
  }
  func.func @transform_9(%arg0: i32) -> (i32, i32) {
    %c0_i32 = arith.constant 0 : i32
    %c0_i32_0 = arith.constant 0 : i32
    return %arg0, %c0_i32 : i32, i32
  }
}

</mosaic_0001>

<bundles_post_ra>
// kernel: tpu_custom_call.1
= control target key start
LH: loop header
LB: loop body
LE: loop exit
PB: predicated region body
PF: predicated region fallthrough
CT: control target
= control target key end

     0   :  { %14 = vsyncpa [#allocation3], 0  ;;  %s947_s0 = inlined_call_operand.hbm [shape: f32[8,128], index: 0, kind: input, shape index: {}]   ;;  %s948_s1 = inlined_call_operand.vmem [shape: f32[1,128], index: 1, kind: input, shape index: {}]   ;;  %s949_s2 = inlined_call_operand.vmem [shape: f32[1,128], index: 2, kind: input, shape index: {}]   ;;  %s950_s3 = inlined_call_operand.hbm [shape: f32[128,128], index: 3, kind: input, shape index: {}]   ;;  %s951_s4 = inlined_call_operand.vmem [shape: f32[1,128], index: 4, kind: input, shape index: {}]   ;;  %s952_s5 = inlined_call_operand.hbm [shape: f32[128,128], index: 5, kind: input, shape index: {}]   ;;  %s953_s6 = inlined_call_operand.vmem [shape: f32[1,128], index: 6, kind: input, shape index: {}]   ;;  %s954_s7 = inlined_call_operand.hbm [shape: f32[128,128], index: 7, kind: input, shape index: {}]   ;;  %s955_s8 = inlined_call_operand.vmem [shape: f32[1,128], index: 8, kind: input, shape index: {}]   ;;  %s956_s9 = inlined_call_operand.hbm [shape: f32[8,128], index: 9, kind: output, shape index: {}]  }
   0x1   :  { %15 = vsyncpa [#allocation6], 0 }
   0x2   :  { %16 = vsyncpa [#allocation9], 0 }
   0x3   :  { %17 = vsyncpa [#allocation4], 0  ;;  %s773_s30 = smov [#allocation5]   ;;  %s655_s13 = scalar_lea.hbm %s950_s3, 2048 }
   0x4   :  { %s37_s10 = sshll.u32 %s773_s30, 4  ;;  %p656_p0 = scmp.ne.s32.totalorder %s950_s3, %s655_s13  ;;  %s38_s10 = int_to_ptr.vmem [resolvable:$true] %s37_s10 }
   0x5   :  { %p659_p1 = scmp.lt.u32.totalorder %s655_s13, %s950_s3 }
   0x7   :  { %p661_p2 = pnand %p659_p1, %p656_p0 }
   0x9   :  { %664 = shalt.err (!%p661_p2)
}
   0xa   :  { %s665_s18 = scalar_lea.vmem %s38_s10, 2048  ;;  %p670_p4 = scmp.lt.s32.totalorder %s38_s10, %s38_s10 }
   0xb   :  { %p666_p3 = scmp.ne.s32.totalorder %s38_s10, %s665_s18  ;;  %p671_p5 = scmp.lt.s32.totalorder %s665_s18, %s665_s18 }
   0xd   :  { %p672_p6 = por %p671_p5, %p670_p4 }
   0xf   :  { %p673_p7 = pnand %p672_p6, %p666_p3 }
  0x11   :  { %676 = shalt.err (!%p673_p7)
}
  0x12   :  { %s774_s19 = smov 128   ;;  %s775_s20 = smov 8  }
  0x13   :  { %43 = dma.hbm_to_vmem [thread:$0]  %s950_s3, 2048, %s38_s10, [#allocation6], %s774_s19, %s774_s19, %s775_s20  }
  0x14   :  { %s776_s23 = smov [#allocation2]   ;;  %s777_s25 = smov [#allocation7]  }
  0x15   :  { %s24_s24 = sshll.u32 %s776_s23, 4  ;;  %s51_s26 = sshll.u32 %s777_s25, 4  ;;  %s25_s24 = int_to_ptr.vmem [resolvable:$true] %s24_s24  ;;  %s52_s26 = int_to_ptr.vmem [resolvable:$true] %s51_s26 }
  0x16   :  { %s677_s29 = scalar_lea.hbm %s947_s0, 128 }
  0x17   :  { %p678_p8 = scmp.ne.s32.totalorder %s947_s0, %s677_s29  ;;  %p681_p9 = scmp.lt.u32.totalorder %s677_s29, %s947_s0 }
  0x19   :  { %p683_p10 = pnand %p681_p9, %p678_p8 }
  0x1b   :  { %686 = shalt.err (!%p683_p10)
}
  0x1c   :  { %s687_s3 = scalar_lea.vmem %s25_s24, 128  ;;  %p692_p12 = scmp.lt.s32.totalorder %s25_s24, %s25_s24 }
  0x1d   :  { %p688_p11 = scmp.ne.s32.totalorder %s25_s24, %s687_s3  ;;  %p693_p13 = scmp.lt.s32.totalorder %s687_s3, %s687_s3 }
  0x1f   :  { %p694_p0 = por %p693_p13, %p692_p12 }
  0x21   :  { %p695_p1 = pnand %p694_p0, %p688_p11 }
  0x23   :  { %698 = shalt.err (!%p695_p1)
}
  0x24   :  { %27 = dma.hbm_to_vmem [thread:$0]  %s947_s0, 128, %s25_s24, [#allocation3]  }
  0x25   :  { %s699_s17 = scalar_lea.hbm %s952_s5, 2048 }
  0x26   :  { %p700_p2 = scmp.ne.s32.totalorder %s952_s5, %s699_s17  ;;  %p703_p3 = scmp.lt.u32.totalorder %s699_s17, %s952_s5 }
  0x28   :  { %p705_p4 = pnand %p703_p3, %p700_p2 }
  0x2a   :  { %708 = shalt.err (!%p705_p4)
}
  0x2b   :  { %s709_s25 = scalar_lea.vmem %s52_s26, 2048  ;;  %p714_p6 = scmp.lt.s32.totalorder %s52_s26, %s52_s26 }
  0x2c   :  { %p710_p5 = scmp.ne.s32.totalorder %s52_s26, %s709_s25  ;;  %p715_p7 = scmp.lt.s32.totalorder %s709_s25, %s709_s25 }
  0x2e   :  { %p716_p8 = por %p715_p7, %p714_p6 }
  0x30   :  { %p717_p9 = pnand %p716_p8, %p710_p5 }
  0x32   :  { %720 = shalt.err (!%p717_p9)
}
  0x33   :  { %57 = dma.hbm_to_vmem [thread:$0]  %s952_s5, 2048, %s52_s26, [#allocation6], %s774_s19, %s774_s19, %s775_s20  }
  0x34   :  { %s778_s27 = smov [#allocation8]   ;;  %s721_s11 = scalar_lea.hbm %s954_s7, 2048 }
  0x35   :  { %s65_s28 = sshll.u32 %s778_s27, 4  ;;  %p722_p10 = scmp.ne.s32.totalorder %s954_s7, %s721_s11  ;;  %s66_s28 = int_to_ptr.vmem [resolvable:$true] %s65_s28 }
  0x36   :  { %p725_p11 = scmp.lt.u32.totalorder %s721_s11, %s954_s7 }
  0x38   :  { %p727_p12 = pnand %p725_p11, %p722_p10 }
  0x3a   :  { %730 = shalt.err (!%p727_p12)
}
  0x3b   :  { %s731_s14 = scalar_lea.vmem %s66_s28, 2048  ;;  %p736_p0 = scmp.lt.s32.totalorder %s66_s28, %s66_s28 }
  0x3c   :  { %p732_p13 = scmp.ne.s32.totalorder %s66_s28, %s731_s14  ;;  %p737_p1 = scmp.lt.s32.totalorder %s731_s14, %s731_s14 }
  0x3e   :  { %p738_p2 = por %p737_p1, %p736_p0 }
  0x40   :  { %p739_p3 = pnand %p738_p2, %p732_p13 }
  0x42   :  { %742 = shalt.err (!%p739_p3)
}
  0x43   :  { %71 = dma.hbm_to_vmem [thread:$0]  %s954_s7, 2048, %s66_s28, [#allocation9], %s774_s19, %s774_s19, %s775_s20  }
  0x44   :  { %765 = dma.done.wait [#allocation3], 128  }
  0x45   :  { %766 = vsyncadd [#allocation3], 4294967168 }
  0x46   :  { %767 = dma.done.wait [#allocation6], 4096  }
  0x47   :  { %768 = vsyncadd [#allocation6], 4294963200 }
  0x48   :  { %769 = dma.done.wait [#allocation9], 2048  }
  0x49   :  { %770 = vsyncadd [#allocation9], 4294965248  ;;  %v779_v0 = vmov 0.0|0.0   ;;  %vm780_vm0 = vmmov 0   ;;  %v781_v1 = vmov 0.0   ;;  %v107_v2 = vld [vmem:[#allocation5] sm:$0xff]  ;;  %v99_v21 = vlaneseq }
  0x4a   :  { %567 = vmatprep.subr.bf16.mxu0 %v779_v0  ;;  %494 = vmatprep.mubr.msk.f32.mxu0 %vm780_vm0, %v781_v1  ;;  %v108_v3 = vld [vmem:[#allocation5 + $0x8] sm:$0xff]  ;;  %v109_v4 = vld [vmem:[#allocation5 + $0x10] sm:$0xff]  ;;  %v110_v6 = vld [vmem:[#allocation5 + $0x18] sm:$0xff]  ;;  %s782_s21 = smov [#allocation10]  }
  0x4b   :  { %591 = vmatprep.subr.bf16.mxu1 %v779_v0  ;;  %529 = vmatprep.mubr.msk.f32.mxu1 %vm780_vm0, %v781_v1  ;;  %v568_v5 = vpack.c.bf16 %v108_v3, %v107_v2  ;;  %v571_v7 = vpack.c.bf16 %v110_v6, %v109_v4  ;;  %v111_v8 = vld [vmem:[#allocation5 + $0x20] sm:$0xff]  ;;  %v112_v9 = vld [vmem:[#allocation5 + $0x28] sm:$0xff]  ;;  %v95_v10 = vld [vmem:[%s949_s2] sm:$0x1]  ;;  %v100_v28 = vshrl.u32 %v99_v21, 7  ;;  %s395_s22 = sshll.u32 %s782_s21, 4  ;;  %s396_s22 = int_to_ptr.vmem [resolvable:$true] %s395_s22 }
  0x4c   :  { %v201_v11 = vld [vmem:[#allocation7] sm:$0xff]  ;;  %v202_v12 = vld [vmem:[#allocation7 + $0x8] sm:$0xff]  ;;  %v574_v13 = vpack.c.bf16 %v112_v9, %v111_v8  ;;  %v96_v14 = vadd.f32 1e-08, %v95_v10  ;;  %v203_v16 = vld [vmem:[#allocation7 + $0x10] sm:$0xff]  ;;  %s743_s23 = scalar_lea.vmem %s396_s22, 128  ;;  %p748_p5 = scmp.lt.s32.totalorder %s396_s22, %s396_s22 }
  0x4d   :  { %569 = vmatpush3.bf16.msra.mxu0 %v568_v5  ;;  %v592_v15 = vpack.c.bf16 %v202_v12, %v201_v11  ;;  %v204_v17 = vld [vmem:[#allocation7 + $0x18] sm:$0xff]  ;;  %v113_v18 = vld [vmem:[#allocation5 + $0x30] sm:$0xff]  ;;  %v205_v22 = vld [vmem:[#allocation7 + $0x20] sm:$0xff]  ;;  %v101_v35 = vsub.s32 0, %v100_v28  ;;  %p744_p4 = scmp.ne.s32.totalorder %s396_s22, %s743_s23  ;;  %p749_p6 = scmp.lt.s32.totalorder %s743_s23, %s743_s23 }
  0x4e   :  { %570 = vmatprep.subr.bf16.mxu0 %v779_v0  ;;  %v114_v19 = vld [vmem:[#allocation5 + $0x38] sm:$0xff]  ;;  %649 = vrsqrt.f32 %v96_v14  ;;  %v595_v20 = vpack.c.bf16 %v204_v17, %v203_v16  ;;  %v206_v23 = vld [vmem:[#allocation7 + $0x28] sm:$0xff]  ;;  %v115_v25 = vld [vmem:[#allocation5 + $0x40] sm:$0xff] }
  0x4f   :  { %593 = vmatpush3.bf16.msra.mxu1 %v592_v15  ;;  %v577_v24 = vpack.c.bf16 %v114_v19, %v113_v18  ;;  %v116_v26 = vld [vmem:[#allocation5 + $0x48] sm:$0xff]  ;;  %v598_v27 = vpack.c.bf16 %v206_v23, %v205_v22  ;;  %v207_v29 = vld [vmem:[#allocation7 + $0x30] sm:$0xff]  ;;  %v208_v30 = vld [vmem:[#allocation7 + $0x38] sm:$0xff]  ;;  %p750_p7 = por %p749_p6, %p748_p5 }
  0x50   :  { %594 = vmatprep.subr.bf16.mxu1 %v779_v0  ;;  %v580_v31 = vpack.c.bf16 %v116_v26, %v115_v25  ;;  %v117_v32 = vld [vmem:[#allocation5 + $0x50] sm:$0xff]  ;;  %v118_v33 = vld [vmem:[#allocation5 + $0x58] sm:$0xff]  ;;  %v601_v34 = vpack.c.bf16 %v208_v30, %v207_v29  ;;  %v209_v36 = vld [vmem:[#allocation7 + $0x40] sm:$0xff] }
  0x51   :  { %572 = vmatpush3.bf16.msra.mxu0 %v571_v7  ;;  %v210_v37 = vld [vmem:[#allocation7 + $0x48] sm:$0xff]  ;;  %v583_v39 = vpack.c.bf16 %v118_v33, %v117_v32  ;;  %v86_v40 = vld [vmem:[#allocation2] sm:$0xff]  ;;  %v119_v42 = vld [vmem:[#allocation5 + $0x60] sm:$0xff]  ;;  %p751_p8 = pnand %p750_p7, %p744_p4 }
  0x52   :  { %573 = vmatprep.subr.bf16.mxu0 %v779_v0  ;;  %v406_v41 = vld [vmem:[%s948_s1] ss:$0 sm:$0xff]  ;;  %v120_v43 = vld [vmem:[#allocation5 + $0x68] sm:$0xff]  ;;  %v604_v44 = vpack.c.bf16 %v210_v37, %v209_v36  ;;  %v121_v48 = vld [vmem:[#allocation5 + $0x70] sm:$0xff] }
  0x53   :  { %596 = vmatpush3.bf16.msra.mxu1 %v595_v20  ;;  %v94_v45 = vsub.f32 %v86_v40, %v406_v41  ;;  %v586_v47 = vpack.c.bf16 %v120_v43, %v119_v42  ;;  %v122_v49 = vld [vmem:[#allocation5 + $0x78] sm:$0xff]  ;;  %v211_v53 = vld [vmem:[#allocation7 + $0x50] sm:$0xff]  ;;  %v213_v56 = vld [vmem:[#allocation7 + $0x60] sm:$0xff] }
  0x54   :  { %597 = vmatprep.subr.bf16.mxu1 %v779_v0  ;;  %v589_v51 = vpack.c.bf16 %v122_v49, %v121_v48  ;;  %v212_v54 = vld [vmem:[#allocation7 + $0x58] sm:$0xff]  ;;  %v214_v57 = vld [vmem:[#allocation7 + $0x68] sm:$0xff]  ;;  %v215_v59 = vld [vmem:[#allocation7 + $0x70] sm:$0xff] }
  0x55   :  { %575 = vmatpush3.bf16.msra.mxu0 %v574_v13  ;;  %v607_v55 = vpack.c.bf16 %v212_v54, %v211_v53  ;;  %v610_v58 = vpack.c.bf16 %v214_v57, %v213_v56  ;;  %v216_v60 = vld [vmem:[#allocation7 + $0x78] sm:$0xff]  ;;  %v295_v62 = vld [vmem:[#allocation8] sm:$0xff]  ;;  %v296_v63 = vld [vmem:[#allocation8 + $0x8] sm:$0xff] }
  0x56   :  { %576 = vmatprep.subr.bf16.mxu0 %v779_v0  ;;  %v613_v61 = vpack.c.bf16 %v216_v60, %v215_v59  ;;  %v297_v2 = vld [vmem:[#allocation8 + $0x10] sm:$0xff]  ;;  %v298_v3 = vld [vmem:[#allocation8 + $0x18] sm:$0xff]  ;;  %v299_v5 = vld [vmem:[#allocation8 + $0x20] sm:$0xff] }
  0x57   :  { %599 = vmatpush3.bf16.msra.mxu1 %v598_v27  ;;  %v619_v4 = vpack.c.bf16 %v298_v3, %v297_v2  ;;  %v300_v6 = vld [vmem:[#allocation8 + $0x28] sm:$0xff]  ;;  %v301_v8 = vld [vmem:[#allocation8 + $0x30] sm:$0xff]  ;;  %v302_v9 = vld [vmem:[#allocation8 + $0x38] sm:$0xff] }
  0x58   :  { %600 = vmatprep.subr.bf16.mxu1 %v779_v0  ;;  %v650_v38 = vpop.eup %649  ;;  %v622_v7 = vpack.c.bf16 %v300_v6, %v299_v5  ;;  %v625_v10 = vpack.c.bf16 %v302_v9, %v301_v8  ;;  %v303_v11 = vld [vmem:[#allocation8 + $0x40] sm:$0xff]  ;;  %v304_v12 = vld [vmem:[#allocation8 + $0x48] sm:$0xff]  ;;  %v408_v14 = vld [vmem:[%s951_s4] ss:$0 sm:$0xff] }
  0x59   :  { %578 = vmatpush3.bf16.msra.mxu0 %v577_v24  ;;  %v102_v46 = vrot.slane %v650_v38, %v101_v35  ;;  %v628_v13 = vpack.c.bf16 %v304_v12, %v303_v11  ;;  %v305_v19 = vld [vmem:[#allocation8 + $0x50] sm:$0xff]  ;;  %v306_v20 = vld [vmem:[#allocation8 + $0x58] sm:$0xff]  ;;  %v307_v22 = vld [vmem:[#allocation8 + $0x60] sm:$0xff] }
  0x5a   :  { %579 = vmatprep.subr.bf16.mxu0 %v779_v0  ;;  %v631_v21 = vpack.c.bf16 %v306_v20, %v305_v19  ;;  %v308_v23 = vld [vmem:[#allocation8 + $0x68] sm:$0xff]  ;;  %v309_v25 = vld [vmem:[#allocation8 + $0x70] sm:$0xff]  ;;  %v310_v26 = vld [vmem:[#allocation8 + $0x78] sm:$0xff] }
  0x5b   :  { %602 = vmatpush3.bf16.msra.mxu1 %v601_v34  ;;  %v104_v50 = vmul.f32 %v102_v46, %v94_v45  ;;  %v634_v24 = vpack.c.bf16 %v308_v23, %v307_v22  ;;  %v637_v27 = vpack.c.bf16 %v310_v26, %v309_v25  ;;  %v409_v28 = vld [vmem:[%s953_s6] ss:$0 sm:$0xff] }
  0x5c   :  { %603 = vmatprep.subr.bf16.mxu1 %v779_v0  ;;  %v410_v33 = vld [vmem:[%s955_s8] ss:$0 sm:$0xff] }
  0x5d   :  { %581 = vmatpush3.bf16.msra.mxu0 %v580_v31  ;;  %v407_v52 = vclamps-f32 %v104_v50, 5.0 }
  0x5e   :  { %582 = vmatprep.subr.bf16.mxu0 %v779_v0 }
  0x5f   :  { %605 = vmatpush3.bf16.msra.mxu1 %v604_v44 }
  0x60   :  { %606 = vmatprep.subr.bf16.mxu1 %v779_v0 }
  0x61   :  { %584 = vmatpush3.bf16.msra.mxu0 %v583_v39 }
  0x62   :  { %585 = vmatprep.subr.bf16.mxu0 %v779_v0 }
  0x63   :  { %608 = vmatpush3.bf16.msra.mxu1 %v607_v55 }
  0x64   :  { %609 = vmatprep.subr.bf16.mxu1 %v779_v0 }
  0x65   :  { %587 = vmatpush3.bf16.msra.mxu0 %v586_v47 }
  0x66   :  { %588 = vmatprep.subr.bf16.mxu0 %v779_v0 }
  0x67   :  { %611 = vmatpush3.bf16.msra.mxu1 %v610_v58 }
  0x68   :  { %612 = vmatprep.subr.bf16.mxu1 %v779_v0 }
  0x69   :  { %590 = vmatpush3.bf16.msra.mxu0 %v589_v51 }
  0x6a   :  { %615 = vmatprep.subr.bf16.mxu0 %v779_v0 }
  0x6b   :  { %614 = vmatpush3.bf16.msra.mxu1 %v613_v61 }
  0x6c   :  { %495 = vmatmul.mubr.f32.vlgmr.msra.gmra.mrb[0].mxu0 %v407_v52 }
  0x6d   :  { %564 = vmatprep.mubr.msk.f32.mxu0 %vm780_vm0, %v781_v1  ;;  %v616_v1 = vpack.c.bf16 %v296_v63, %v295_v62 }
  0x6f   :  { %617 = vmatpush3.bf16.msra.mxu0 %v616_v1 }
  0x70   :  { %618 = vmatprep.subr.bf16.mxu0 %v779_v0 }
  0x73   :  { %620 = vmatpush3.bf16.msra.mxu0 %v619_v4 }
  0x74   :  { %621 = vmatprep.subr.bf16.mxu0 %v779_v0 }
  0x77   :  { %623 = vmatpush3.bf16.msra.mxu0 %v622_v7 }
  0x78   :  { %624 = vmatprep.subr.bf16.mxu0 %v779_v0 }
  0x7b   :  { %626 = vmatpush3.bf16.msra.mxu0 %v625_v10 }
  0x7c   :  { %627 = vmatprep.subr.bf16.mxu0 %v779_v0 }
  0x7f   :  { %629 = vmatpush3.bf16.msra.mxu0 %v628_v13 }
  0x80   :  { %630 = vmatprep.subr.bf16.mxu0 %v779_v0 }
  0x83   :  { %632 = vmatpush3.bf16.msra.mxu0 %v631_v21 }
  0x84   :  { %633 = vmatprep.subr.bf16.mxu0 %v779_v0 }
  0x87   :  { %635 = vmatpush3.bf16.msra.mxu0 %v634_v24 }
  0x88   :  { %636 = vmatprep.subr.bf16.mxu0 %v779_v0 }
  0x8b   :  { %638 = vmatpush3.bf16.msra.mxu0 %v637_v27 }
 0x13f   :  { %v196_v15 = vpop.f32.mrb[0].mxu0 }
 0x140   :  { %v197_v16 = vadd.f32 %v408_v14, %v196_v15  ;;  %v496_v17 = vpop.f32.mrb[1].mxu0 }
 0x142   :  { %651 = vtanh.f32 %v197_v16 }
 0x14c   :  { %v652_v18 = vpop.eup %651 }
 0x14d   :  { %530 = vmatmul.mubr.f32.vlgmr.msra.gmra.mrb[0].mxu1 %v652_v18 }
 0x220   :  { %v290_v29 = vpop.f32.mrb[0].mxu1 }
 0x221   :  { %v291_v30 = vadd.f32 %v409_v28, %v290_v29  ;;  %v531_v31 = vpop.f32.mrb[1].mxu1 }
 0x223   :  { %653 = vtanh.f32 %v291_v30 }
 0x22d   :  { %v654_v32 = vpop.eup %653 }
 0x22e   :  { %565 = vmatmul.mubr.f32.vlgmr.msra.gmra.mrb[2].mxu0 %v654_v32 }
 0x301   :  { %v384_v34 = vpop.f32.mrb[2].mxu0 }
 0x302   :  { %v385_v35 = vadd.f32 %v410_v33, %v384_v34  ;;  %v566_v0 = vpop.f32.mrb[3].mxu0 }
 0x304   :  { %388 = vst [vmem:[#allocation10] sm:$0xff] %v385_v35 }
 0x305   :  { %754 = shalt.err (!%p751_p8)
}
 0x306   :  { %s755_s0 = scalar_lea.hbm %s956_s9, 128 }
 0x307   :  { %p756_p9 = scmp.ne.s32.totalorder %s956_s9, %s755_s0  ;;  %p759_p10 = scmp.lt.u32.totalorder %s755_s0, %s956_s9 }
 0x309   :  { %p761_p11 = pnand %p759_p10, %p756_p9 }
 0x30b   :  { %764 = shalt.err (!%p761_p11)
}
 0x30c   :  { %398 = dma.vmem_to_hbm [thread:$0]  %s396_s22, 128, %s956_s9, [#allocation4]  }
 0x30d   :  { %771 = dma.done.wait [#allocation4], 128  }
 0x30e   :  { %772 = vsyncadd [#allocation4], 4294967168 }
 0x30f   :  { %402 = vsyncpa [#allocation3], 1 }
 0x310   :  { %403 = vsyncpa [#allocation6], 1 }
 0x311   :  { %404 = vsyncpa [#allocation9], 1 }
 0x312   :  { %405 = vsyncpa [#allocation4], 1 }

</bundles_post_ra>
